<compile_context>
chip_gen: v5e
topology: v5e:2x2
jax: 0.10.0
libtpu: 0.0.40
codegen_flags: <defaults>
</compile_context>

<pallas_src>
import jax
import jax.numpy as jnp
from jax.experimental import pallas as pl
from jax.experimental.pallas import tpu as pltpu


def _round_up(x, m):
    return (x + m - 1) // m * m


def _cdiv(a, b):
    return -(-a // b)


# ----------------------------------------------------------------------------
# Kernel
# ----------------------------------------------------------------------------
def highway_kernel(x_ref, w_ref, b_ref, o_ref):
    x = x_ref[...]                       # [tile_r, L]   (PACK samples per row)
    L = x.shape[-1]

    # Single fused matmul on the MXU in the weight dtype (bf16), f32 accumulate.
    xm = x if x.dtype == w_ref.dtype else x.astype(w_ref.dtype)
    y = jnp.dot(xm, w_ref[...], preferred_element_type=jnp.float32) + b_ref[...]

    x_proj = jnp.maximum(y[:, :L], 0.0)      # relu     (VPU)
    x_gate = jax.nn.sigmoid(y[:, L:])        # sigmoid  (EUP slot, ~free)

    xf = x.astype(jnp.float32)
    # highway combine:  p*g + (1-g)*x  ==  x + g*(p - x)   (fewer VALU ops)
    o_ref[...] = (xf + x_gate * (x_proj - xf)).astype(o_ref.dtype)


# ----------------------------------------------------------------------------
# One-time parameter preparation (outside the hot path)
# ----------------------------------------------------------------------------
def prepare_highway_params(w_proj, b_proj, w_gate, b_gate,
                           compute_dtype=jnp.bfloat16):
    """Fuse / lane-pack / lane-pad the two Linear layers ONCE.

    Returns (w_fused [L, 2L], b_fused [1, 2L], pack, e_pad) where
    L = pack * e_pad is a multiple of 128 (lane-dense).
    """
    E = w_proj.shape[0]
    if E <= 128 and 128 % E == 0:
        pack, e_pad = 128 // E, E                 # lane-pack `pack` samples
    else:
        pack, e_pad = 1, _round_up(E, 128)        # zero-pad E to lane multiple

    def pad_wT(w):                                # [E,E] -> [e_pad,e_pad], as x @ W.T
        wt = w.T
        if e_pad != E:
            wt = jnp.pad(wt, ((0, e_pad - E), (0, e_pad - E)))
        return wt

    def pad_b(b):
        return b if e_pad == E else jnp.pad(b, (0, e_pad - E))

    eye = jnp.eye(pack, dtype=w_proj.dtype)
    # Block-diagonal so `pack` lane-packed samples are transformed independently.
    wp_block = jnp.kron(eye, pad_wT(w_proj))      # [L, L]
    wg_block = jnp.kron(eye, pad_wT(w_gate))      # [L, L]
    w_fused = jnp.concatenate([wp_block, wg_block], axis=1).astype(compute_dtype)

    L = pack * e_pad
    b_fused = jnp.concatenate([jnp.tile(pad_b(b_proj), pack),
                               jnp.tile(pad_b(b_gate), pack)])
    b_fused = b_fused.reshape(1, 2 * L).astype(jnp.float32)
    return w_fused, b_fused, pack, e_pad


# ----------------------------------------------------------------------------
# Forward wrapper
# ----------------------------------------------------------------------------
def highway_forward(conv_out, w_fused, b_fused, pack, e_pad, *,
                    tile_rows=4096, out_dtype=None):
    """conv_out: [..., E].  Other args from prepare_highway_params."""
    orig_shape = conv_out.shape
    E = orig_shape[-1]
    out_dtype = conv_out.dtype if out_dtype is None else out_dtype

    x2 = conv_out.reshape(-1, E)
    B = x2.shape[0]
    if e_pad != E:                                # lane-dense column padding
        x2 = jnp.pad(x2, ((0, 0), (0, e_pad - E)))
    L = pack * e_pad                              # lane width of the slab (mult of 128)

    # --- row tiling -----------------------------------------------------------
    # dtype-aware sublane multiple: 8 (f32), 16 (bf16), 32 (int8/fp8)
    sublane = max(8, 32 // jnp.dtype(x2.dtype).itemsize,
                  32 // jnp.dtype(out_dtype).itemsize)
    R = _cdiv(B, pack)                            # slab rows actually needed
    R8 = _round_up(R, sublane)

    tile_cap = max(int(tile_rows), sublane)
    n_steps = _cdiv(R8, tile_cap)
    if R8 >= 2 * sublane:                         # >=2 steps: keep both v7x TCs busy
        n_steps = max(n_steps, 2)
    tile_r = _round_up(_cdiv(R8, n_steps), sublane)
    Rp = n_steps * tile_r                         # padding waste < n_steps*sublane rows
    Bp = Rp * pack

    if Bp != B:
        x2 = jnp.pad(x2, ((0, Bp - B), (0, 0)))
    x_slab = x2.reshape(Rp, L)                    # row-major -> free reshape

    # --- VMEM budget (actual footprint + headroom, never the full v7x 64 MiB) --
    x_item = jnp.dtype(x_slab.dtype).itemsize
    o_item = jnp.dtype(out_dtype).itemsize
    w_item = jnp.dtype(w_fused.dtype).itemsize
    vmem_bytes = (2 * tile_r * L * x_item         # input tile  (double buffered)
                  + 2 * tile_r * L * o_item       # output tile (double buffered)
                  + 2 * (L * 2 * L) * w_item      # fused weight (<=2 buffers)
                  + 2 * (2 * L) * 4               # fused bias
                  + 3 * tile_r * 2 * L * 4)       # f32 intermediates (y, proj/gate, xf)
    vmem_limit = min(max(int(vmem_bytes) + (4 << 20), 16 << 20), 48 << 20)

    # --- BlockSpecs -----------------------------------------------------------
    def _resident_spec(shape):
        # Weight / bias block index never changes: a single buffer is enough.
        try:
            return pl.BlockSpec(shape, lambda i: (0, 0),
                                pipeline_mode=pl.Buffered(1))
        except Exception:  # older jax without pipeline_mode / Buffered(1)
            return pl.BlockSpec(shape, lambda i: (0, 0))

    out_slab = pl.pallas_call(
        highway_kernel,
        out_shape=jax.ShapeDtypeStruct((Rp, L), out_dtype),
        grid=(Rp // tile_r,),
        in_specs=[
            pl.BlockSpec((tile_r, L), lambda i: (i, 0)),   # x tile (pipelined)
            _resident_spec((L, 2 * L)),                    # fused weight (resident)
            _resident_spec((1, 2 * L)),                    # fused bias   (resident)
        ],
        out_specs=pl.BlockSpec((tile_r, L), lambda i: (i, 0)),
        compiler_params=pltpu.CompilerParams(
            dimension_semantics=("parallel",),             # shard rows across TCs
            vmem_limit_bytes=vmem_limit,
        ),
    )(x_slab, w_fused, b_fused)

    out = out_slab.reshape(Bp, e_pad)             # free (same layout)
    if Bp != B:
        out = out[:B]
    if e_pad != E:
        out = out[:, :E]
    return out.reshape(orig_shape[:-1] + (E,))


def highway_reference(conv_out, w_proj, b_proj, w_gate, b_gate):
    """Pure-JAX reference mirroring the PyTorch forward."""
    x_proj = jax.nn.relu(conv_out @ w_proj.T + b_proj)
    x_gate = jax.nn.sigmoid(conv_out @ w_gate.T + b_gate)
    return x_proj * x_gate + (1.0 - x_gate) * conv_out


if __name__ == "__main__":
    embed_size = 32
    batch = 8

    key = jax.random.PRNGKey(0)
    kx, kwp, kbp, kwg, kbg = jax.random.split(key, 5)

    # Deterministic synthetic parameters (PyTorch nn.Linear-style uniform init).
    bound = 1.0 / float(embed_size) ** 0.5
    w_proj = jax.random.uniform(kwp, (embed_size, embed_size), jnp.float32, -bound, bound)
    b_proj = jax.random.uniform(kbp, (embed_size,), jnp.float32, -bound, bound)
    w_gate = jax.random.uniform(kwg, (embed_size, embed_size), jnp.float32, -bound, bound)
    b_gate = jax.random.uniform(kbg, (embed_size,), jnp.float32, -bound, bound)

    conv_out = jax.random.normal(kx, (batch, embed_size), jnp.float32)

    # Fuse / pack parameters once (outside the per-call hot path).
    w_fused, b_fused, pack, e_pad = prepare_highway_params(w_proj, b_proj, w_gate, b_gate)

    out = highway_forward(conv_out, w_fused, b_fused, pack, e_pad)
    out = jax.block_until_ready(out)

    ref = highway_reference(conv_out, w_proj, b_proj, w_gate, b_gate)
    assert out.shape == (batch, embed_size)
    # bf16 MXU operands (f32 accumulation) -> looser tolerance vs the f32 reference.
    assert jnp.allclose(out, ref, atol=3e-2, rtol=3e-2), "mismatch vs reference"

    print("KERNEL_OK")
</pallas_src>

<mosaic_0001>
module attributes {stable_mosaic.version = 11 : i64} {
  func.func @highway_kernel(%arg0: i32, %arg1: memref<8x128xf32, #tpu.memory_space<vmem>>, %arg2: memref<128x256xbf16, #tpu.memory_space<vmem>>, %arg3: memref<1x256xf32, #tpu.memory_space<vmem>>, %arg4: memref<8x128xf32, #tpu.memory_space<vmem>>) attributes {dimension_semantics = [#tpu.dimension_semantics<parallel>], iteration_bounds = array<i64: 1>, scalar_prefetch = 0 : i64, scratch_operands = 0 : i64, tpu.core_type = #tpu.core_type<tc>, window_params = [{transform_indices = @transform_0, window_bounds = array<i64: 8, 128>}, {pipeline_mode = #tpu.pipeline_mode<synchronous>, transform_indices = @transform_1, window_bounds = array<i64: 128, 256>}, {pipeline_mode = #tpu.pipeline_mode<synchronous>, transform_indices = @transform_2, window_bounds = array<i64: 1, 256>}, {transform_indices = @transform_3, window_bounds = array<i64: 8, 128>}]} {
    %c0 = arith.constant 0 : index
    %c0_0 = arith.constant 0 : index
    %0 = vector.load %arg1[%c0, %c0_0] : memref<8x128xf32, #tpu.memory_space<vmem>>, vector<8x128xf32>
    %1 = arith.truncf %0 : vector<8x128xf32> to vector<8x128xbf16>
    %c0_1 = arith.constant 0 : index
    %c0_2 = arith.constant 0 : index
    %2 = vector.load %arg2[%c0_1, %c0_2] : memref<128x256xbf16, #tpu.memory_space<vmem>>, vector<128x256xbf16>
    %cst = arith.constant dense<0.000000e+00> : vector<8x256xf32>
    %3 = tpu.matmul %1, %2, %cst {dimension_numbers = #tpu.dot_dimension_numbers<[1], [0], [0], [1], [0, 0, 1, 1], [], []>} : vector<8x128xbf16>, vector<128x256xbf16>, vector<8x256xf32> -> vector<8x256xf32>
    %c0_3 = arith.constant 0 : index
    %c0_4 = arith.constant 0 : index
    %4 = vector.load %arg3[%c0_3, %c0_4] : memref<1x256xf32, #tpu.memory_space<vmem>>, vector<1x256xf32>
    %5 = vector.broadcast %4 : vector<1x256xf32> to vector<8x256xf32>
    %6 = arith.addf %3, %5 : vector<8x256xf32>
    %7 = vector.extract_strided_slice %6 {offsets = [0, 0], sizes = [8, 128], strides = [1, 1]} : vector<8x256xf32> to vector<8x128xf32>
    %cst_5 = arith.constant 0.000000e+00 : f32
    %8 = vector.broadcast %cst_5 : f32 to vector<8x128xf32>
    %9 = arith.maximumf %7, %8 : vector<8x128xf32>
    %10 = vector.extract_strided_slice %6 {offsets = [0, 128], sizes = [8, 128], strides = [1, 1]} : vector<8x256xf32> to vector<8x128xf32>
    %11 = arith.negf %10 : vector<8x128xf32>
    %12 = math.exp %11 : vector<8x128xf32>
    %cst_6 = arith.constant 1.000000e+00 : f32
    %13 = vector.broadcast %cst_6 : f32 to vector<8x128xf32>
    %14 = arith.addf %13, %12 : vector<8x128xf32>
    %15 = arith.divf %13, %14 : vector<8x128xf32>
    %16 = arith.subf %9, %0 : vector<8x128xf32>
    %17 = arith.mulf %15, %16 : vector<8x128xf32>
    %18 = arith.addf %0, %17 : vector<8x128xf32>
    %c0_7 = arith.constant 0 : index
    %c0_8 = arith.constant 0 : index
    %19 = vector.load %arg4[%c0_7, %c0_8] : memref<8x128xf32, #tpu.memory_space<vmem>>, vector<8x128xf32>
    tpu.vector_store %arg4[%c0_7, %c0_8], %18 {strides = array<i32>} : memref<8x128xf32, #tpu.memory_space<vmem>>, vector<8x128xf32>,
    return
  }
  func.func @transform_0(%arg0: i32) -> (i32, i32) {
    %c0_i32 = arith.constant 0 : i32
    %c0_i32_0 = arith.constant 0 : i32
    return %arg0, %c0_i32 : i32, i32
  }
  func.func @transform_1(%arg0: i32) -> (i32, i32) {
    %c0_i32 = arith.constant 0 : i32
    %c0_i32_0 = arith.constant 0 : i32
    %c0_i32_1 = arith.constant 0 : i32
    return %c0_i32, %c0_i32_0 : i32, i32
  }
  func.func @transform_2(%arg0: i32) -> (i32, i32) {
    %c0_i32 = arith.constant 0 : i32
    %c0_i32_0 = arith.constant 0 : i32
    %c0_i32_1 = arith.constant 0 : i32
    return %c0_i32, %c0_i32_0 : i32, i32
  }
  func.func @transform_3(%arg0: i32) -> (i32, i32) {
    %c0_i32 = arith.constant 0 : i32
    %c0_i32_0 = arith.constant 0 : i32
    return %arg0, %c0_i32 : i32, i32
  }
}

</mosaic_0001>

<bundles_post_ra>
// kernel: tpu_custom_call.1
= control target key start
LH: loop header
LB: loop body
LE: loop exit
PB: predicated region body
PF: predicated region fallthrough
CT: control target
= control target key end

     0   :  { %8 = vsyncpa [#allocation3], 0  ;;  %s461_s0 = inlined_call_operand.hbm [shape: f32[8,128], index: 0, kind: input, shape index: {}]   ;;  %s462_s1 = inlined_call_operand.hbm [shape: bf16[128,256], index: 1, kind: input, shape index: {}]   ;;  %s463_s2 = inlined_call_operand.hbm [shape: f32[1,256], index: 2, kind: input, shape index: {}]   ;;  %s464_s3 = inlined_call_operand.hbm [shape: f32[8,128], index: 3, kind: output, shape index: {}]  }
   0x1   :  { %9 = vsyncpa [#allocation6], 0  ;;  %s26_s14 = sshll.u32 %s462_s1, 4  ;;  %s27_s14 = int_to_ptr.hbm [resolvable:$true] %s26_s14 }
   0x2   :  { %10 = vsyncpa [#allocation4], 0  ;;  %s423_s15 = smov [#allocation5]   ;;  %s16_s19 = sshll.u32 %s461_s0, 4  ;;  %s17_s19 = int_to_ptr.hbm [resolvable:$true] %s16_s19 }
   0x3   :  { %s28_s16 = sshll.u32 %s423_s15, 4  ;;  %s424_s20 = smov 128   ;;  %s29_s16 = int_to_ptr.vmem [resolvable:$true] %s28_s16 }
   0x4   :  { %s425_s21 = smov 8   ;;  %s426_s22 = smov [#allocation2]  }
   0x5   :  { %34 = dma.hbm_to_vmem [thread:$0]  %s27_s14, 2048, %s29_s16, [#allocation6], %s424_s20, %s424_s20, %s425_s21  }
   0x6   :  { %s18_s23 = sshll.u32 %s426_s22, 4  ;;  %s40_s26 = sshll.u32 %s463_s2, 4  ;;  %s19_s23 = int_to_ptr.vmem [resolvable:$true] %s18_s23  ;;  %s41_s26 = int_to_ptr.hbm [resolvable:$true] %s40_s26 }
   0x7   :  { %21 = dma.hbm_to_vmem [thread:$0]  %s17_s19, 128, %s19_s23, [#allocation3]  }
   0x8   :  { %s427_s1 = smov [#allocation7]  }
   0x9   :  { %s42_s27 = sshll.u32 %s427_s1, 4  ;;  %s43_s27 = int_to_ptr.vmem [resolvable:$true] %s42_s27 }
   0xa   :  { %45 = dma.hbm_to_vmem [thread:$0]  %s41_s26, 32, %s43_s27, [#allocation6]  }
   0xb   :  { %417 = dma.done.wait [#allocation3], 128  }
   0xc   :  { %418 = vsyncadd [#allocation3], 4294967168 }
   0xd   :  { %419 = dma.done.wait [#allocation6], 2080  }
   0xe   :  { %420 = vsyncadd [#allocation6], 4294965216  ;;  %v309_v0 = vld [vmem:[#allocation5 + $0x74] sm:$0xf]  ;;  %v290_v1 = vld [vmem:[#allocation5 + $0x78] sm:$0xf0] }
   0xf   :  { %v307_v2 = vld [vmem:[#allocation5 + $0x64] sm:$0xf]  ;;  %v293_v3 = vor.u32 %v309_v0, %v290_v1  ;;  %v282_v4 = vld [vmem:[#allocation5 + $0x68] sm:$0xf0]  ;;  %v288_v5 = vld [vmem:[#allocation5 + $0x70] sm:$0xf] }
  0x10   :  { %v285_v6 = vor.u32 %v307_v2, %v282_v4  ;;  %v305_v7 = vld [vmem:[#allocation5 + $0x54] sm:$0xf]  ;;  %v310_v8 = vld [vmem:[#allocation5 + $0x74] sm:$0xf0]  ;;  %v274_v9 = vld [vmem:[#allocation5 + $0x58] sm:$0xf0] }
  0x11   :  { %175 = vmatpush.bf16.msra.mxu1 %v293_v3  ;;  %v289_v10 = vor.u32 %v310_v8, %v288_v5  ;;  %v280_v11 = vld [vmem:[#allocation5 + $0x60] sm:$0xf]  ;;  %v308_v12 = vld [vmem:[#allocation5 + $0x64] sm:$0xf0]  ;;  %v277_v14 = vor.u32 %v305_v7, %v274_v9  ;;  %v272_v15 = vld [vmem:[#allocation5 + $0x50] sm:$0xf] }
  0x12   :  { %v281_v13 = vor.u32 %v308_v12, %v280_v11  ;;  %v306_v16 = vld [vmem:[#allocation5 + $0x54] sm:$0xf0]  ;;  %v303_v17 = vld [vmem:[#allocation5 + $0x44] sm:$0xf]  ;;  %v266_v18 = vld [vmem:[#allocation5 + $0x48] sm:$0xf0] }
  0x13   :  { %162 = vmatpush.bf16.msra.mxu0 %v289_v10  ;;  %v273_v19 = vor.u32 %v306_v16, %v272_v15  ;;  %v269_v20 = vor.u32 %v303_v17, %v266_v18  ;;  %v264_v21 = vld [vmem:[#allocation5 + $0x40] sm:$0xf]  ;;  %v304_v22 = vld [vmem:[#allocation5 + $0x44] sm:$0xf0]  ;;  %v301_v23 = vld [vmem:[#allocation5 + $0x34] sm:$0xf] }
  0x14   :  { %v258_v24 = vld [vmem:[#allocation5 + $0x38] sm:$0xf0]  ;;  %v265_v25 = vor.u32 %v304_v22, %v264_v21  ;;  %v256_v27 = vld [vmem:[#allocation5 + $0x30] sm:$0xf]  ;;  %v302_v28 = vld [vmem:[#allocation5 + $0x34] sm:$0xf0] }
  0x15   :  { %176 = vmatpush.bf16.msra.mxu1 %v285_v6  ;;  %v261_v26 = vor.u32 %v301_v23, %v258_v24  ;;  %v299_v29 = vld [vmem:[#allocation5 + $0x24] sm:$0xf]  ;;  %v250_v30 = vld [vmem:[#allocation5 + $0x28] sm:$0xf0]  ;;  %v257_v31 = vor.u32 %v302_v28, %v256_v27  ;;  %v248_v33 = vld [vmem:[#allocation5 + $0x20] sm:$0xf] }
  0x16   :  { %v253_v32 = vor.u32 %v299_v29, %v250_v30  ;;  %v300_v34 = vld [vmem:[#allocation5 + $0x24] sm:$0xf0]  ;;  %v297_v35 = vld [vmem:[#allocation5 + $0x14] sm:$0xf]  ;;  %v242_v36 = vld [vmem:[#allocation5 + $0x18] sm:$0xf0] }
  0x17   :  { %163 = vmatpush.bf16.msra.mxu0 %v281_v13  ;;  %v249_v37 = vor.u32 %v300_v34, %v248_v33  ;;  %v245_v38 = vor.u32 %v297_v35, %v242_v36  ;;  %v240_v39 = vld [vmem:[#allocation5 + $0x10] sm:$0xf]  ;;  %v298_v40 = vld [vmem:[#allocation5 + $0x14] sm:$0xf0]  ;;  %v295_v41 = vld [vmem:[#allocation5 + $0x4] sm:$0xf] }
  0x18   :  { %v234_v42 = vld [vmem:[#allocation5 + $0x8] sm:$0xf0]  ;;  %v241_v43 = vor.u32 %v298_v40, %v240_v39  ;;  %v58_v45 = vld [vmem:[#allocation2] sm:$0xff]  ;;  %v232_v46 = vld [vmem:[#allocation5] sm:$0xf]  ;;  %s428_s0 = smov [#allocation8]  }
  0x19   :  { %177 = vmatpush.bf16.msra.mxu1 %v277_v14  ;;  %v237_v44 = vor.u32 %v295_v41, %v234_v42  ;;  %v296_v47 = vld [vmem:[#allocation5 + $0x4] sm:$0xf0]  ;;  %v59_v48 = vpack.c.bf16 %v58_v45, %v58_v45  ;;  %v76_v50 = vld [vmem:[#allocation7] sm:$0x3]  ;;  %s217_s2 = sshll.u32 %s428_s0, 4  ;;  %s219_s30 = sshll.u32 %s464_s3, 4  ;;  %s218_s2 = int_to_ptr.vmem [resolvable:$true] %s217_s2  ;;  %s220_s30 = int_to_ptr.hbm [resolvable:$true] %s219_s30 }
  0x1a   :  { %v233_v49 = vor.u32 %v296_v47, %v232_v46  ;;  %v79_v51 = vperm.slane %v76_v50, 1  ;;  %v78_v60 = vperm.slane %v76_v50, 0 }
  0x1b   :  { %164 = vmatpush.bf16.msra.mxu0 %v273_v19 }
  0x1d   :  { %178 = vmatpush.bf16.msra.mxu1 %v269_v20 }
  0x1f   :  { %165 = vmatpush.bf16.msra.mxu0 %v265_v25 }
  0x21   :  { %179 = vmatpush.bf16.msra.mxu1 %v261_v26 }
  0x23   :  { %166 = vmatpush.bf16.msra.mxu0 %v257_v31 }
  0x25   :  { %180 = vmatpush.bf16.msra.mxu1 %v253_v32 }
  0x27   :  { %167 = vmatpush.bf16.msra.mxu0 %v249_v37 }
  0x29   :  { %181 = vmatpush.bf16.msra.mxu1 %v245_v38 }
  0x2b   :  { %168 = vmatpush.bf16.msra.mxu0 %v241_v43 }
  0x2d   :  { %182 = vmatpush.bf16.msra.mxu1 %v237_v44 }
  0x2f   :  { %169 = vmatpush.bf16.msra.mxu0 %v233_v49 }
  0x30   :  { %183 = vmatmul.bf16.vlgmr.msra.gmra.mxu1 %v59_v48 }
  0x32   :  { %170 = vmatmul.bf16.vlgmr.msra.gmra.mxu0 %v59_v48 }
  0xad   :  { %v184_v52 = vpop.f32.mrf.mxu1 }
  0xae   :  { %v185_v53 = vadd.f32 %v184_v52, %v79_v51 }
  0xaf   :  { %v171_v55 = vpop.f32.mrf.mxu0 }
  0xb0   :  { %v294_v54 = vmul.f32 -1.442695, %v185_v53  ;;  %v172_v61 = vadd.f32 %v171_v55, %v78_v60 }
  0xb2   :  { %317 = vpow2.f32 %v294_v54  ;;  %v188_v1 = vmax.f32 %v172_v61, 0.0 }
  0xb4   :  { %v208_v6 = vsub.f32 %v188_v1, %v58_v45 }
  0xb5   :  { %v186_v56 = vpop.f32.mrf.mxu1 }
  0xb7   :  { %v173_v58 = vpop.f32.mrf.mxu0 }
  0xb8   :  { %v318_v57 = vpop.eup %317 }
  0xb9   :  { %v192_v59 = vadd.f32 1.0, %v318_v57 }
  0xbb   :  { %319 = vrcp.f32 %v192_v59  ;;  %v204_v2 = vand.u32 2147483648, %v192_v59  ;;  %v202_v4 = vand.u32 2147483647, %v192_v59  ;;  %vm198_vm1 = vweird.f32 %v192_v59 }
  0xbd   :  { %v205_v7 = vor.u32 1.1754944e-38, %v204_v2  ;;  %vm203_vm3 = vcmp.eq.f32.partialorder %v202_v4, 8.507059e+37 }
  0xc1   :  { %v320_v62 = vpop.eup %319 }
  0xc2   :  { %v194_v63 = vmul.f32 %v320_v62, %v192_v59  ;;  %vm199_vm0 = vweird.f32 %v320_v62 }
  0xc3   :  { %vm200_vm2 = vmor %vm198_vm1, %vm199_vm0 }
  0xc4   :  { %v195_v0 = vsub.f32 1.0, %v194_v63 }
  0xc6   :  { %v196_v3 = vmul.f32 %v320_v62, %v195_v0 }
  0xc8   :  { %v197_v5 = vadd.f32 %v320_v62, %v196_v3 }
  0xca   :  { %v201_v8 = vsel %vm200_vm2, %v320_v62, %v197_v5 }
  0xcb   :  { %v206_v9 = vsel %vm203_vm3, %v205_v7, %v201_v8 }
  0xcc   :  { %v209_v10 = vmul.f32 %v208_v6, %v206_v9 }
  0xce   :  { %v210_v11 = vadd.f32 %v209_v10, %v58_v45 }
  0xd0   :  { %211 = vst [vmem:[#allocation8] sm:$0xff] %v210_v11 }
  0xd1   :  { %222 = dma.vmem_to_hbm [thread:$0]  %s218_s2, 128, %s220_s30, [#allocation4]  }
  0xd2   :  { %421 = dma.done.wait [#allocation4], 128  }
  0xd3   :  { %422 = vsyncadd [#allocation4], 4294967168 }
  0xd4   :  { %227 = vsyncpa [#allocation3], 1 }
  0xd5   :  { %228 = vsyncpa [#allocation6], 1 }
  0xd6   :  { %229 = vsyncpa [#allocation4], 1 }

</bundles_post_ra>
